<compile_context>
chip_gen: v6e
topology: v6e:2x2x1
jax: 0.10.0
libtpu: 0.0.40
codegen_flags: <defaults>
</compile_context>

<pallas_src>
import numpy as np
import jax
import jax.numpy as jnp
from jax.experimental import pallas as pl
from jax.experimental.pallas import tpu as pltpu

NUM_LAYERS = 3          # module default is 6; kept small for the demo
EMB = 128               # node/edge/cell embedding dim (module default 512)
PAD_IN = 128            # padded per-rank input-feature lane width
BN_EPS = 1e-5


# ----------------------------- Pallas kernel --------------------------------
def make_kernel(n_nodes, n_edges, n_cells, fuse_k):
    """Build the kernel body with static problem sizes / chip flag."""

    def kernel(
        feat_ref,            # (n_total, 3*PAD_IN) bf16 block-banded features
        w_in_ref,            # (3*PAD_IN, EMB) bf16 K-stacked fc_input weights
        b_in_ref,            # (3, 1, EMB) f32 fc_input biases
        a0t_ref, b0_ref,     # live message matrices M[0][0].T, M[1][0].T (bf16)
        wcat_ref,            # fc_emb weights for to_rank=0 (bf16):
                             #   fused: (2*EMB, EMB)   unfused: (2, EMB, EMB)
        gamma_ref, beta_ref, # BatchNorm affine params (3, 1, EMB) f32
        poolt_ref,           # (n_graphs, n_nodes) normalized mean-pool matrix
        x0_out, x1_out, x2_out, g_out,
    ):
        f32 = jnp.float32
        bf16 = jnp.bfloat16

        # fc_input: one fused bf16 matmul over the block-banded feature slab.
        Xall = jnp.dot(feat_ref[...], w_in_ref[...], preferred_element_type=f32)
        X0 = Xall[0:n_nodes] + b_in_ref[0]
        X1 = Xall[n_nodes:n_nodes + n_edges] + b_in_ref[1]
        X2 = Xall[n_nodes + n_edges:n_nodes + n_edges + n_cells] + b_in_ref[2]

        def bn_sigmoid(z, i):
            # BatchNorm1d, training-mode batch statistics (biased variance),
            # two-pass for numerical safety.  Affine params read per call
            # (no loop-invariant vregs held across iterations).
            gamma = gamma_ref[i]
            beta = beta_ref[i]
            mean = jnp.mean(z, axis=0, keepdims=True)
            d = z - mean
            var = jnp.mean(d * d, axis=0, keepdims=True)
            u = d * jax.lax.rsqrt(var + BN_EPS) * gamma + beta
            # sigmoid(u) = 0.5*tanh(0.5*u) + 0.5 : one exact EUP op.
            # Dropout(0.1): identity (eval semantics).
            return 0.5 * jnp.tanh(0.5 * u) + 0.5

        def layer(_, carry):
            X0, X1, X2 = carry
            # Only M[0][0]=A0 and M[1][0]=B0^T are nonzero in the reference
            # forward; the 7 statically-zero message paths are skipped (their
            # Linear biases cancel under BN mean subtraction -> dropped).
            # Structure matrices / weights are re-read from VMEM each
            # iteration to keep vreg pressure low.
            pre0 = jnp.dot(a0t_ref[...], X0.astype(bf16),
                           preferred_element_type=f32).astype(bf16)
            pre1 = jnp.dot(b0_ref[...], X1.astype(bf16),
                           preferred_element_type=f32).astype(bf16)
            if fuse_k:
                # v6e/v7x: fill the 256-deep MXU with one K=2E matmul.
                pre = jnp.concatenate([pre0, pre1], axis=-1)
                H0 = jnp.dot(pre, wcat_ref[...], preferred_element_type=f32)
            else:
                # v5e: 128-deep MXU -> two K=E matmuls, no lane concat.
                H0 = (jnp.dot(pre0, wcat_ref[0], preferred_element_type=f32)
                      + jnp.dot(pre1, wcat_ref[1], preferred_element_type=f32))
            new_X0 = bn_sigmoid(H0 + X0, 0)
            new_X1 = bn_sigmoid(X1, 1)
            new_X2 = bn_sigmoid(X2, 2)
            return new_X0, new_X1, new_X2

        X0, X1, X2 = jax.lax.fori_loop(0, NUM_LAYERS, layer, (X0, X1, X2))

        x0_out[...] = X0
        x1_out[...] = X1
        x2_out[...] = X2
        # mean-pool over batch assignment (poolT = normalized one-hot matrix)
        g_out[...] = jnp.dot(poolt_ref[...], X0, preferred_element_type=f32)

    return kernel


def _full_spec(shape):
    nd = len(shape)
    return pl.BlockSpec(shape, lambda i, _nd=nd: (0,) * _nd)


def _vmem_limit_bytes(args, out_shapes):
    # Derive the VMEM budget from the actual resident buffers (double-buffered
    # inputs/outputs + compiler scratch headroom), clamped to a sane range.
    total = sum(int(np.prod(a.shape)) * np.dtype(a.dtype).itemsize for a in args)
    total += sum(int(np.prod(s.shape)) * np.dtype(s.dtype).itemsize
                 for s in out_shapes)
    return int(min(max(4 * total + (2 << 20), 16 << 20), 64 << 20))


def _is_v5e():
    try:
        kind = jax.devices()[0].device_kind.lower()
        return ("v5 lite" in kind) or ("v5e" in kind) or ("v5litepod" in kind)
    except Exception:
        return False


def topotein_forward(feat, w_in, b_in, a0t, b0, wcat, gamma, beta, poolT,
                     *, n_nodes, n_edges, n_cells, fuse_k):
    args = (feat, w_in, b_in, a0t, b0, wcat, gamma, beta, poolT)
    out_shapes = (
        jax.ShapeDtypeStruct((n_nodes, EMB), jnp.float32),
        jax.ShapeDtypeStruct((n_edges, EMB), jnp.float32),
        jax.ShapeDtypeStruct((n_cells, EMB), jnp.float32),
        jax.ShapeDtypeStruct((poolT.shape[0], EMB), jnp.float32),
    )
    return pl.pallas_call(
        make_kernel(n_nodes, n_edges, n_cells, fuse_k),
        out_shape=out_shapes,
        grid=(1,),
        in_specs=[_full_spec(a.shape) for a in args],
        out_specs=tuple(_full_spec(s.shape) for s in out_shapes),
        compiler_params=pltpu.CompilerParams(
            dimension_semantics=("arbitrary",),
            vmem_limit_bytes=_vmem_limit_bytes(args, out_shapes),
        ),
    )(*args)


# ----------------------------- pure-JAX reference ---------------------------
# Faithful f32 re-implementation of the torch forward (all 9 message paths,
# with all Linear biases, two-pass BN, exact sigmoid) used for validation.
def reference_forward(x, e, c, w_in, b_in, MT_list, wemb, bemb, gamma, beta, poolT):
    X = [x @ w_in[0] + b_in[0], e @ w_in[1] + b_in[1], c @ w_in[2] + b_in[2]]
    MT = [[MT_list[f * 3 + t] for t in range(3)] for f in range(3)]
    for _ in range(NUM_LAYERS):
        H = []
        for t in range(3):
            acc = None
            for f in range(3):
                k = f * 3 + t
                contrib = (MT[f][t] @ X[f]) @ wemb[k] + bemb[k]
                acc = contrib if acc is None else acc + contrib
            H.append(acc)
        for i in range(3):
            z = H[i] + X[i]
            mean = jnp.mean(z, axis=0, keepdims=True)
            var = jnp.mean((z - mean) ** 2, axis=0, keepdims=True)
            zhat = (z - mean) / jnp.sqrt(var + BN_EPS) * gamma[i] + beta[i]
            X[i] = 1.0 / (1.0 + jnp.exp(-zhat))
    return X[0], X[1], X[2], poolT @ X[0]


# ---------------------------------- main -------------------------------------
if __name__ == "__main__":
    n_nodes, n_edges, n_cells, n_graphs = 16, 32, 8, 2
    node_in, edge_in, cell_in = 60, 122, 64     # module default input dims

    # synthetic unsigned cell-complex structure matrices (glue)
    B0 = np.zeros((n_nodes, n_edges), np.float32)
    for j in range(n_edges):
        u = j % n_nodes
        v = (u + 1 + j // n_nodes) % n_nodes
        B0[u, j] = 1.0
        B0[v, j] = 1.0
    B1 = np.zeros((n_edges, n_cells), np.float32)
    for k in range(n_cells):
        B1[4 * k:4 * k + 4, k] = 1.0
    A0 = np.clip(B0 @ B0.T, 0, 1).astype(np.float32); np.fill_diagonal(A0, 0)
    coA1 = np.clip(B0.T @ B0, 0, 1).astype(np.float32); np.fill_diagonal(coA1, 0)
    A1 = np.clip(B1 @ B1.T, 0, 1).astype(np.float32); np.fill_diagonal(A1, 0)

    # batch assignment + mean-pool matrix (transposed: (n_graphs, n_nodes))
    batch_vec = np.repeat(np.arange(n_graphs), n_nodes // n_graphs)
    poolT = np.zeros((n_graphs, n_nodes), np.float32)
    for g in range(n_graphs):
        idx = np.where(batch_vec == g)[0]
        poolT[g, idx] = 1.0 / len(idx)
    poolT = jnp.asarray(poolT)

    # deterministic inputs + parameters
    key = jax.random.PRNGKey(0)
    keys = jax.random.split(key, 8)
    x = jax.random.normal(keys[0], (n_nodes, node_in), jnp.float32)
    e = jax.random.normal(keys[1], (n_edges, edge_in), jnp.float32)
    c = jax.random.normal(keys[2], (n_cells, cell_in), jnp.float32)

    def init_lin(k, din, dout):
        kw, kb = jax.random.split(k)
        s = 1.0 / np.sqrt(din)
        w = jax.random.uniform(kw, (din, dout), jnp.float32, -s, s)
        b = jax.random.uniform(kb, (1, dout), jnp.float32, -s, s)
        return w, b

    w_in0, b_in0 = init_lin(keys[3], node_in, EMB)
    w_in1, b_in1 = init_lin(keys[4], edge_in, EMB)
    w_in2, b_in2 = init_lin(keys[5], cell_in, EMB)

    emb_keys = jax.random.split(keys[6], 9)
    wemb_l, bemb_l = [], []
    for i in range(9):
        w, b = init_lin(emb_keys[i], EMB, EMB)
        wemb_l.append(w)
        bemb_l.append(b)
    wemb = jnp.stack(wemb_l)                    # (9, EMB, EMB)
    bemb = jnp.stack(bemb_l)                    # (9, 1, EMB)

    gamma = jnp.ones((3, 1, EMB), jnp.float32)  # BN weight init
    beta = jnp.zeros((3, 1, EMB), jnp.float32)  # BN bias init

    # build the M message matrices exactly as in the torch forward (glue)
    B0j, B1j, A0j, A1j, coA1j = map(jnp.asarray, (B0, B1, A0, A1, coA1))
    M2_0 = (B1j.T @ B0j.T) / 2.0
    M2_1 = M2_0 @ B0j
    M2_2 = (M2_0 @ A0j) @ M2_0.T
    M = [
        [A0j,        B0j * 0.0,            M2_0.T * 0.0],
        [B0j.T,      (A1j + coA1j) * 0.0,  B1j * 0.0],
        [M2_0 * 0.0, M2_1 * 0.0,           M2_2 * 0.0],
    ]
    MT_list = [M[f][t].T for f in range(3) for t in range(3)]   # reference only

    # ------------- kernel-side packing / padding (glue, zero cost) ----------
    # block-banded feature slab: each rank in its own 128-lane band (bf16)
    def band(a, idx):
        left = idx * PAD_IN
        return jnp.pad(a, ((0, 0), (left, 3 * PAD_IN - left - a.shape[1])))

    feat_bf = jnp.concatenate([band(x, 0), band(e, 1), band(c, 2)],
                              axis=0).astype(jnp.bfloat16)       # (56, 384)

    def padk(w):
        return jnp.pad(w, ((0, PAD_IN - w.shape[0]), (0, 0)))

    w_in_stacked = jnp.concatenate(
        [padk(w_in0), padk(w_in1), padk(w_in2)], axis=0).astype(jnp.bfloat16)  # (384, EMB)
    b_in_stacked = jnp.stack([b_in0, b_in1, b_in2])                            # (3, 1, EMB)

    # live message matrices (pre-transposed), binary -> exact in bf16
    a0t_bf = M[0][0].T.astype(jnp.bfloat16)     # (n_nodes, n_nodes)
    b0_bf = M[1][0].T.astype(jnp.bfloat16)      # (n_nodes, n_edges)

    # fc_emb weights for to_rank=0.  K=2E fusion only pays on the 256-deep
    # MXU of v6e/v7x; on v5e keep two K=E matmuls (no lane concat).
    fuse_k = not _is_v5e()
    if fuse_k:
        wcat = jnp.concatenate([wemb[0], wemb[3]], axis=0).astype(jnp.bfloat16)  # (2E, E)
    else:
        wcat = jnp.stack([wemb[0], wemb[3]]).astype(jnp.bfloat16)                # (2, E, E)

    outs = topotein_forward(
        feat_bf, w_in_stacked, b_in_stacked, a0t_bf, b0_bf, wcat,
        gamma, beta, poolT,
        n_nodes=n_nodes, n_edges=n_edges, n_cells=n_cells, fuse_k=fuse_k)
    outs = jax.block_until_ready(outs)

    ref = reference_forward(
        x, e, c,
        [w_in0, w_in1, w_in2], [b_in0, b_in1, b_in2],
        MT_list, wemb, bemb, gamma, beta, poolT)

    names = ["node_embedding", "edge_embedding", "cell_embedding", "graph_embedding"]
    # bf16 MXU inputs/activations introduce ~1e-3 level differences vs f32 ref
    for name, o, r in zip(names, outs, ref):
        np.testing.assert_allclose(np.asarray(o), np.asarray(r),
                                   atol=2e-2, rtol=2e-2, err_msg=name)

    print("KERNEL_OK")
</pallas_src>

<mosaic_0001>
module attributes {stable_mosaic.version = 11 : i64} {
  func.func @kernel(%arg0: i32, %arg1: memref<56x384xbf16, #tpu.memory_space<vmem>>, %arg2: memref<384x128xbf16, #tpu.memory_space<vmem>>, %arg3: memref<3x1x128xf32, #tpu.memory_space<vmem>>, %arg4: memref<16x16xbf16, #tpu.memory_space<vmem>>, %arg5: memref<16x32xbf16, #tpu.memory_space<vmem>>, %arg6: memref<256x128xbf16, #tpu.memory_space<vmem>>, %arg7: memref<3x1x128xf32, #tpu.memory_space<vmem>>, %arg8: memref<3x1x128xf32, #tpu.memory_space<vmem>>, %arg9: memref<2x16xf32, #tpu.memory_space<vmem>>, %arg10: memref<16x128xf32, #tpu.memory_space<vmem>>, %arg11: memref<32x128xf32, #tpu.memory_space<vmem>>, %arg12: memref<8x128xf32, #tpu.memory_space<vmem>>, %arg13: memref<2x128xf32, #tpu.memory_space<vmem>>) attributes {dimension_semantics = [#tpu.dimension_semantics<arbitrary>], iteration_bounds = array<i64: 1>, scalar_prefetch = 0 : i64, scratch_operands = 0 : i64, tpu.core_type = #tpu.core_type<tc>, window_params = [{pipeline_mode = #tpu.pipeline_mode<synchronous>, transform_indices = @transform_0, window_bounds = array<i64: 56, 384>}, {pipeline_mode = #tpu.pipeline_mode<synchronous>, transform_indices = @transform_1, window_bounds = array<i64: 384, 128>}, {pipeline_mode = #tpu.pipeline_mode<synchronous>, transform_indices = @transform_2, window_bounds = array<i64: 3, 1, 128>}, {pipeline_mode = #tpu.pipeline_mode<synchronous>, transform_indices = @transform_3, window_bounds = array<i64: 16, 16>}, {pipeline_mode = #tpu.pipeline_mode<synchronous>, transform_indices = @transform_4, window_bounds = array<i64: 16, 32>}, {pipeline_mode = #tpu.pipeline_mode<synchronous>, transform_indices = @transform_5, window_bounds = array<i64: 256, 128>}, {pipeline_mode = #tpu.pipeline_mode<synchronous>, transform_indices = @transform_6, window_bounds = array<i64: 3, 1, 128>}, {pipeline_mode = #tpu.pipeline_mode<synchronous>, transform_indices = @transform_7, window_bounds = array<i64: 3, 1, 128>}, {pipeline_mode = #tpu.pipeline_mode<synchronous>, transform_indices = @transform_8, window_bounds = array<i64: 2, 16>}, {pipeline_mode = #tpu.pipeline_mode<synchronous>, transform_indices = @transform_9, window_bounds = array<i64: 16, 128>}, {pipeline_mode = #tpu.pipeline_mode<synchronous>, transform_indices = @transform_10, window_bounds = array<i64: 32, 128>}, {pipeline_mode = #tpu.pipeline_mode<synchronous>, transform_indices = @transform_11, window_bounds = array<i64: 8, 128>}, {pipeline_mode = #tpu.pipeline_mode<synchronous>, transform_indices = @transform_12, window_bounds = array<i64: 2, 128>}]} {
    %c0 = arith.constant 0 : index
    %c0_0 = arith.constant 0 : index
    %0 = vector.load %arg1[%c0, %c0_0] : memref<56x384xbf16, #tpu.memory_space<vmem>>, vector<56x384xbf16>
    %c0_1 = arith.constant 0 : index
    %c0_2 = arith.constant 0 : index
    %1 = vector.load %arg2[%c0_1, %c0_2] : memref<384x128xbf16, #tpu.memory_space<vmem>>, vector<384x128xbf16>
    %cst = arith.constant dense<0.000000e+00> : vector<56x128xf32>
    %2 = tpu.matmul %0, %1, %cst {dimension_numbers = #tpu.dot_dimension_numbers<[1], [0], [0], [1], [0, 0, 1, 1], [], []>} : vector<56x384xbf16>, vector<384x128xbf16>, vector<56x128xf32> -> vector<56x128xf32>
    %3 = vector.extract_strided_slice %2 {offsets = [0, 0], sizes = [16, 128], strides = [1, 1]} : vector<56x128xf32> to vector<16x128xf32>
    %c0_3 = arith.constant 0 : index
    %c0_4 = arith.constant 0 : index
    %c0_5 = arith.constant 0 : index
    %4 = vector.load %arg3[%c0_3, %c0_4, %c0_5] : memref<3x1x128xf32, #tpu.memory_space<vmem>>, vector<1x1x128xf32>
    %5 = vector.shape_cast %4 : vector<1x1x128xf32> to vector<1x128xf32>
    %6 = vector.broadcast %5 : vector<1x128xf32> to vector<16x128xf32>
    %7 = arith.addf %3, %6 : vector<16x128xf32>
    %8 = vector.extract_strided_slice %2 {offsets = [16, 0], sizes = [32, 128], strides = [1, 1]} : vector<56x128xf32> to vector<32x128xf32>
    %c1 = arith.constant 1 : index
    %c0_6 = arith.constant 0 : index
    %c0_7 = arith.constant 0 : index
    %9 = vector.load %arg3[%c1, %c0_6, %c0_7] : memref<3x1x128xf32, #tpu.memory_space<vmem>>, vector<1x1x128xf32>
    %10 = vector.shape_cast %9 : vector<1x1x128xf32> to vector<1x128xf32>
    %11 = vector.broadcast %10 : vector<1x128xf32> to vector<32x128xf32>
    %12 = arith.addf %8, %11 : vector<32x128xf32>
    %13 = vector.extract_strided_slice %2 {offsets = [48, 0], sizes = [8, 128], strides = [1, 1]} : vector<56x128xf32> to vector<8x128xf32>
    %c2 = arith.constant 2 : index
    %c0_8 = arith.constant 0 : index
    %c0_9 = arith.constant 0 : index
    %14 = vector.load %arg3[%c2, %c0_8, %c0_9] : memref<3x1x128xf32, #tpu.memory_space<vmem>>, vector<1x1x128xf32>
    %15 = vector.shape_cast %14 : vector<1x1x128xf32> to vector<1x128xf32>
    %16 = vector.broadcast %15 : vector<1x128xf32> to vector<8x128xf32>
    %17 = arith.addf %13, %16 : vector<8x128xf32>
    %c0_i32 = arith.constant 0 : i32
    %c3_i32 = arith.constant 3 : i32
    %18 = arith.addi %c0_i32, %c3_i32 : i32
    %c1_i32 = arith.constant 1 : i32
    %19:3 = scf.for %arg14 = %c0_i32 to %18 step %c1_i32 iter_args(%arg15 = %7, %arg16 = %12, %arg17 = %17) -> (vector<16x128xf32>, vector<32x128xf32>, vector<8x128xf32>)  : i32 {
      %c0_21 = arith.constant 0 : index
      %c0_22 = arith.constant 0 : index
      %26 = vector.load %arg4[%c0_21, %c0_22] : memref<16x16xbf16, #tpu.memory_space<vmem>>, vector<16x16xbf16>
      %27 = arith.truncf %arg15 : vector<16x128xf32> to vector<16x128xbf16>
      %cst_23 = arith.constant dense<0.000000e+00> : vector<16x128xf32>
      %28 = tpu.matmul %26, %27, %cst_23 {dimension_numbers = #tpu.dot_dimension_numbers<[1], [0], [0], [1], [0, 0, 1, 1], [], []>} : vector<16x16xbf16>, vector<16x128xbf16>, vector<16x128xf32> -> vector<16x128xf32>
      %29 = arith.truncf %28 : vector<16x128xf32> to vector<16x128xbf16>
      %c0_24 = arith.constant 0 : index
      %c0_25 = arith.constant 0 : index
      %30 = vector.load %arg5[%c0_24, %c0_25] : memref<16x32xbf16, #tpu.memory_space<vmem>>, vector<16x32xbf16>
      %31 = arith.truncf %arg16 : vector<32x128xf32> to vector<32x128xbf16>
      %cst_26 = arith.constant dense<0.000000e+00> : vector<16x128xf32>
      %32 = tpu.matmul %30, %31, %cst_26 {dimension_numbers = #tpu.dot_dimension_numbers<[1], [0], [0], [1], [0, 0, 1, 1], [], []>} : vector<16x32xbf16>, vector<32x128xbf16>, vector<16x128xf32> -> vector<16x128xf32>
      %33 = arith.truncf %32 : vector<16x128xf32> to vector<16x128xbf16>
      %34 = tpu.concatenate %29, %33 in 1 : vector<16x128xbf16>, vector<16x128xbf16> -> vector<16x256xbf16>
      %c0_27 = arith.constant 0 : index
      %c0_28 = arith.constant 0 : index
      %35 = vector.load %arg6[%c0_27, %c0_28] : memref<256x128xbf16, #tpu.memory_space<vmem>>, vector<256x128xbf16>
      %cst_29 = arith.constant dense<0.000000e+00> : vector<16x128xf32>
      %36 = tpu.matmul %34, %35, %cst_29 {dimension_numbers = #tpu.dot_dimension_numbers<[1], [0], [0], [1], [0, 0, 1, 1], [], []>} : vector<16x256xbf16>, vector<256x128xbf16>, vector<16x128xf32> -> vector<16x128xf32>
      %37 = arith.addf %36, %arg15 : vector<16x128xf32>
      %c0_30 = arith.constant 0 : index
      %c0_31 = arith.constant 0 : index
      %c0_32 = arith.constant 0 : index
      %38 = vector.load %arg7[%c0_30, %c0_31, %c0_32] : memref<3x1x128xf32, #tpu.memory_space<vmem>>, vector<1x1x128xf32>
      %39 = vector.shape_cast %38 : vector<1x1x128xf32> to vector<1x128xf32>
      %c0_33 = arith.constant 0 : index
      %c0_34 = arith.constant 0 : index
      %c0_35 = arith.constant 0 : index
      %40 = vector.load %arg8[%c0_33, %c0_34, %c0_35] : memref<3x1x128xf32, #tpu.memory_space<vmem>>, vector<1x1x128xf32>
      %41 = vector.shape_cast %40 : vector<1x1x128xf32> to vector<1x128xf32>
      %cst_36 = arith.constant dense<0.000000e+00> : vector<128xf32>
      %42 = vector.multi_reduction <add>, %37, %cst_36 [0] : vector<16x128xf32> to vector<128xf32>
      %43 = vector.shape_cast %42 : vector<128xf32> to vector<1x128xf32>
      %cst_37 = arith.constant 1.600000e+01 : f32
      %44 = vector.broadcast %cst_37 : f32 to vector<1x128xf32>
      %45 = arith.divf %43, %44 : vector<1x128xf32>
      %46 = vector.broadcast %45 : vector<1x128xf32> to vector<16x128xf32>
      %47 = arith.subf %37, %46 : vector<16x128xf32>
      %48 = arith.mulf %47, %47 : vector<16x128xf32>
      %cst_38 = arith.constant dense<0.000000e+00> : vector<128xf32>
      %49 = vector.multi_reduction <add>, %48, %cst_38 [0] : vector<16x128xf32> to vector<128xf32>
      %50 = vector.shape_cast %49 : vector<128xf32> to vector<1x128xf32>
      %cst_39 = arith.constant 1.600000e+01 : f32
      %51 = vector.broadcast %cst_39 : f32 to vector<1x128xf32>
      %52 = arith.divf %50, %51 : vector<1x128xf32>
      %cst_40 = arith.constant 9.99999974E-6 : f32
      %53 = vector.broadcast %cst_40 : f32 to vector<1x128xf32>
      %54 = arith.addf %52, %53 : vector<1x128xf32>
      %55 = math.rsqrt %54 : vector<1x128xf32>
      %56 = vector.broadcast %55 : vector<1x128xf32> to vector<16x128xf32>
      %57 = arith.mulf %47, %56 : vector<16x128xf32>
      %58 = vector.broadcast %39 : vector<1x128xf32> to vector<16x128xf32>
      %59 = arith.mulf %57, %58 : vector<16x128xf32>
      %60 = vector.broadcast %41 : vector<1x128xf32> to vector<16x128xf32>
      %61 = arith.addf %59, %60 : vector<16x128xf32>
      %cst_41 = arith.constant 5.000000e-01 : f32
      %62 = vector.broadcast %cst_41 : f32 to vector<16x128xf32>
      %63 = arith.mulf %62, %61 : vector<16x128xf32>
      %64 = math.tanh %63 : vector<16x128xf32>
      %cst_42 = arith.constant 5.000000e-01 : f32
      %65 = vector.broadcast %cst_42 : f32 to vector<16x128xf32>
      %66 = arith.mulf %65, %64 : vector<16x128xf32>
      %cst_43 = arith.constant 5.000000e-01 : f32
      %67 = vector.broadcast %cst_43 : f32 to vector<16x128xf32>
      %68 = arith.addf %66, %67 : vector<16x128xf32>
      %c1_44 = arith.constant 1 : index
      %c0_45 = arith.constant 0 : index
      %c0_46 = arith.constant 0 : index
      %69 = vector.load %arg7[%c1_44, %c0_45, %c0_46] : memref<3x1x128xf32, #tpu.memory_space<vmem>>, vector<1x1x128xf32>
      %70 = vector.shape_cast %69 : vector<1x1x128xf32> to vector<1x128xf32>
      %c1_47 = arith.constant 1 : index
      %c0_48 = arith.constant 0 : index
      %c0_49 = arith.constant 0 : index
      %71 = vector.load %arg8[%c1_47, %c0_48, %c0_49] : memref<3x1x128xf32, #tpu.memory_space<vmem>>, vector<1x1x128xf32>
      %72 = vector.shape_cast %71 : vector<1x1x128xf32> to vector<1x128xf32>
      %cst_50 = arith.constant dense<0.000000e+00> : vector<128xf32>
      %73 = vector.multi_reduction <add>, %arg16, %cst_50 [0] : vector<32x128xf32> to vector<128xf32>
      %74 = vector.shape_cast %73 : vector<128xf32> to vector<1x128xf32>
      %cst_51 = arith.constant 3.200000e+01 : f32
      %75 = vector.broadcast %cst_51 : f32 to vector<1x128xf32>
      %76 = arith.divf %74, %75 : vector<1x128xf32>
      %77 = vector.broadcast %76 : vector<1x128xf32> to vector<32x128xf32>
      %78 = arith.subf %arg16, %77 : vector<32x128xf32>
      %79 = arith.mulf %78, %78 : vector<32x128xf32>
      %cst_52 = arith.constant dense<0.000000e+00> : vector<128xf32>
      %80 = vector.multi_reduction <add>, %79, %cst_52 [0] : vector<32x128xf32> to vector<128xf32>
      %81 = vector.shape_cast %80 : vector<128xf32> to vector<1x128xf32>
      %cst_53 = arith.constant 3.200000e+01 : f32
      %82 = vector.broadcast %cst_53 : f32 to vector<1x128xf32>
      %83 = arith.divf %81, %82 : vector<1x128xf32>
      %cst_54 = arith.constant 9.99999974E-6 : f32
      %84 = vector.broadcast %cst_54 : f32 to vector<1x128xf32>
      %85 = arith.addf %83, %84 : vector<1x128xf32>
      %86 = math.rsqrt %85 : vector<1x128xf32>
      %87 = vector.broadcast %86 : vector<1x128xf32> to vector<32x128xf32>
      %88 = arith.mulf %78, %87 : vector<32x128xf32>
      %89 = vector.broadcast %70 : vector<1x128xf32> to vector<32x128xf32>
      %90 = arith.mulf %88, %89 : vector<32x128xf32>
      %91 = vector.broadcast %72 : vector<1x128xf32> to vector<32x128xf32>
      %92 = arith.addf %90, %91 : vector<32x128xf32>
      %cst_55 = arith.constant 5.000000e-01 : f32
      %93 = vector.broadcast %cst_55 : f32 to vector<32x128xf32>
      %94 = arith.mulf %93, %92 : vector<32x128xf32>
      %95 = math.tanh %94 : vector<32x128xf32>
      %cst_56 = arith.constant 5.000000e-01 : f32
      %96 = vector.broadcast %cst_56 : f32 to vector<32x128xf32>
      %97 = arith.mulf %96, %95 : vector<32x128xf32>
      %cst_57 = arith.constant 5.000000e-01 : f32
      %98 = vector.broadcast %cst_57 : f32 to vector<32x128xf32>
      %99 = arith.addf %97, %98 : vector<32x128xf32>
      %c2_58 = arith.constant 2 : index
      %c0_59 = arith.constant 0 : index
      %c0_60 = arith.constant 0 : index
      %100 = vector.load %arg7[%c2_58, %c0_59, %c0_60] : memref<3x1x128xf32, #tpu.memory_space<vmem>>, vector<1x1x128xf32>
      %101 = vector.shape_cast %100 : vector<1x1x128xf32> to vector<1x128xf32>
      %c2_61 = arith.constant 2 : index
      %c0_62 = arith.constant 0 : index
      %c0_63 = arith.constant 0 : index
      %102 = vector.load %arg8[%c2_61, %c0_62, %c0_63] : memref<3x1x128xf32, #tpu.memory_space<vmem>>, vector<1x1x128xf32>
      %103 = vector.shape_cast %102 : vector<1x1x128xf32> to vector<1x128xf32>
      %cst_64 = arith.constant dense<0.000000e+00> : vector<128xf32>
      %104 = vector.multi_reduction <add>, %arg17, %cst_64 [0] : vector<8x128xf32> to vector<128xf32>
      %105 = vector.shape_cast %104 : vector<128xf32> to vector<1x128xf32>
      %cst_65 = arith.constant 8.000000e+00 : f32
      %106 = vector.broadcast %cst_65 : f32 to vector<1x128xf32>
      %107 = arith.divf %105, %106 : vector<1x128xf32>
      %108 = vector.broadcast %107 : vector<1x128xf32> to vector<8x128xf32>
      %109 = arith.subf %arg17, %108 : vector<8x128xf32>
      %110 = arith.mulf %109, %109 : vector<8x128xf32>
      %cst_66 = arith.constant dense<0.000000e+00> : vector<128xf32>
      %111 = vector.multi_reduction <add>, %110, %cst_66 [0] : vector<8x128xf32> to vector<128xf32>
      %112 = vector.shape_cast %111 : vector<128xf32> to vector<1x128xf32>
      %cst_67 = arith.constant 8.000000e+00 : f32
      %113 = vector.broadcast %cst_67 : f32 to vector<1x128xf32>
      %114 = arith.divf %112, %113 : vector<1x128xf32>
      %cst_68 = arith.constant 9.99999974E-6 : f32
      %115 = vector.broadcast %cst_68 : f32 to vector<1x128xf32>
      %116 = arith.addf %114, %115 : vector<1x128xf32>
      %117 = math.rsqrt %116 : vector<1x128xf32>
      %118 = vector.broadcast %117 : vector<1x128xf32> to vector<8x128xf32>
      %119 = arith.mulf %109, %118 : vector<8x128xf32>
      %120 = vector.broadcast %101 : vector<1x128xf32> to vector<8x128xf32>
      %121 = arith.mulf %119, %120 : vector<8x128xf32>
      %122 = vector.broadcast %103 : vector<1x128xf32> to vector<8x128xf32>
      %123 = arith.addf %121, %122 : vector<8x128xf32>
      %cst_69 = arith.constant 5.000000e-01 : f32
      %124 = vector.broadcast %cst_69 : f32 to vector<8x128xf32>
      %125 = arith.mulf %124, %123 : vector<8x128xf32>
      %126 = math.tanh %125 : vector<8x128xf32>
      %cst_70 = arith.constant 5.000000e-01 : f32
      %127 = vector.broadcast %cst_70 : f32 to vector<8x128xf32>
      %128 = arith.mulf %127, %126 : vector<8x128xf32>
      %cst_71 = arith.constant 5.000000e-01 : f32
      %129 = vector.broadcast %cst_71 : f32 to vector<8x128xf32>
      %130 = arith.addf %128, %129 : vector<8x128xf32>
      scf.yield %68, %99, %130 : vector<16x128xf32>, vector<32x128xf32>, vector<8x128xf32>
    }
    %c0_10 = arith.constant 0 : index
    %c0_11 = arith.constant 0 : index
    %20 = vector.load %arg10[%c0_10, %c0_11] : memref<16x128xf32, #tpu.memory_space<vmem>>, vector<16x128xf32>
    tpu.vector_store %arg10[%c0_10, %c0_11], %19#0 {strides = array<i32>} : memref<16x128xf32, #tpu.memory_space<vmem>>, vector<16x128xf32>,
    %c0_12 = arith.constant 0 : index
    %c0_13 = arith.constant 0 : index
    %21 = vector.load %arg11[%c0_12, %c0_13] : memref<32x128xf32, #tpu.memory_space<vmem>>, vector<32x128xf32>
    tpu.vector_store %arg11[%c0_12, %c0_13], %19#1 {strides = array<i32>} : memref<32x128xf32, #tpu.memory_space<vmem>>, vector<32x128xf32>,
    %c0_14 = arith.constant 0 : index
    %c0_15 = arith.constant 0 : index
    %22 = vector.load %arg12[%c0_14, %c0_15] : memref<8x128xf32, #tpu.memory_space<vmem>>, vector<8x128xf32>
    tpu.vector_store %arg12[%c0_14, %c0_15], %19#2 {strides = array<i32>} : memref<8x128xf32, #tpu.memory_space<vmem>>, vector<8x128xf32>,
    %c0_16 = arith.constant 0 : index
    %c0_17 = arith.constant 0 : index
    %23 = vector.load %arg9[%c0_16, %c0_17] : memref<2x16xf32, #tpu.memory_space<vmem>>, vector<2x16xf32>
    %cst_18 = arith.constant dense<0.000000e+00> : vector<2x128xf32>
    %24 = tpu.matmul %23, %19#0, %cst_18 {dimension_numbers = #tpu.dot_dimension_numbers<[1], [0], [0], [1], [0, 0, 1, 1], [], []>} : vector<2x16xf32>, vector<16x128xf32>, vector<2x128xf32> -> vector<2x128xf32>
    %c0_19 = arith.constant 0 : index
    %c0_20 = arith.constant 0 : index
    %25 = vector.load %arg13[%c0_19, %c0_20] : memref<2x128xf32, #tpu.memory_space<vmem>>, vector<2x128xf32>
    tpu.vector_store %arg13[%c0_19, %c0_20], %24 {strides = array<i32>} : memref<2x128xf32, #tpu.memory_space<vmem>>, vector<2x128xf32>,
    return
  }
  func.func @transform_0(%arg0: i32) -> (i32, i32) {
    %c0_i32 = arith.constant 0 : i32
    %c0_i32_0 = arith.constant 0 : i32
    %c0_i32_1 = arith.constant 0 : i32
    return %c0_i32, %c0_i32_0 : i32, i32
  }
  func.func @transform_1(%arg0: i32) -> (i32, i32) {
    %c0_i32 = arith.constant 0 : i32
    %c0_i32_0 = arith.constant 0 : i32
    %c0_i32_1 = arith.constant 0 : i32
    return %c0_i32, %c0_i32_0 : i32, i32
  }
  func.func @transform_2(%arg0: i32) -> (i32, i32, i32) {
    %c0_i32 = arith.constant 0 : i32
    %c0_i32_0 = arith.constant 0 : i32
    %c0_i32_1 = arith.constant 0 : i32
    %c0_i32_2 = arith.constant 0 : i32
    return %c0_i32, %c0_i32_0, %c0_i32_1 : i32, i32, i32
  }
  func.func @transform_3(%arg0: i32) -> (i32, i32) {
    %c0_i32 = arith.constant 0 : i32
    %c0_i32_0 = arith.constant 0 : i32
    %c0_i32_1 = arith.constant 0 : i32
    return %c0_i32, %c0_i32_0 : i32, i32
  }
  func.func @transform_4(%arg0: i32) -> (i32, i32) {
    %c0_i32 = arith.constant 0 : i32
    %c0_i32_0 = arith.constant 0 : i32
    %c0_i32_1 = arith.constant 0 : i32
    return %c0_i32, %c0_i32_0 : i32, i32
  }
  func.func @transform_5(%arg0: i32) -> (i32, i32) {
    %c0_i32 = arith.constant 0 : i32
    %c0_i32_0 = arith.constant 0 : i32
    %c0_i32_1 = arith.constant 0 : i32
    return %c0_i32, %c0_i32_0 : i32, i32
  }
  func.func @transform_6(%arg0: i32) -> (i32, i32, i32) {
    %c0_i32 = arith.constant 0 : i32
    %c0_i32_0 = arith.constant 0 : i32
    %c0_i32_1 = arith.constant 0 : i32
    %c0_i32_2 = arith.constant 0 : i32
    return %c0_i32, %c0_i32_0, %c0_i32_1 : i32, i32, i32
  }
  func.func @transform_7(%arg0: i32) -> (i32, i32, i32) {
    %c0_i32 = arith.constant 0 : i32
    %c0_i32_0 = arith.constant 0 : i32
    %c0_i32_1 = arith.constant 0 : i32
    %c0_i32_2 = arith.constant 0 : i32
    return %c0_i32, %c0_i32_0, %c0_i32_1 : i32, i32, i32
  }
  func.func @transform_8(%arg0: i32) -> (i32, i32) {
    %c0_i32 = arith.constant 0 : i32
    %c0_i32_0 = arith.constant 0 : i32
    %c0_i32_1 = arith.constant 0 : i32
    return %c0_i32, %c0_i32_0 : i32, i32
  }
  func.func @transform_9(%arg0: i32) -> (i32, i32) {
    %c0_i32 = arith.constant 0 : i32
    %c0_i32_0 = arith.constant 0 : i32
    %c0_i32_1 = arith.constant 0 : i32
    return %c0_i32, %c0_i32_0 : i32, i32
  }
  func.func @transform_10(%arg0: i32) -> (i32, i32) {
    %c0_i32 = arith.constant 0 : i32
    %c0_i32_0 = arith.constant 0 : i32
    %c0_i32_1 = arith.constant 0 : i32
    return %c0_i32, %c0_i32_0 : i32, i32
  }
  func.func @transform_11(%arg0: i32) -> (i32, i32) {
    %c0_i32 = arith.constant 0 : i32
    %c0_i32_0 = arith.constant 0 : i32
    %c0_i32_1 = arith.constant 0 : i32
    return %c0_i32, %c0_i32_0 : i32, i32
  }
  func.func @transform_12(%arg0: i32) -> (i32, i32) {
    %c0_i32 = arith.constant 0 : i32
    %c0_i32_0 = arith.constant 0 : i32
    %c0_i32_1 = arith.constant 0 : i32
    return %c0_i32, %c0_i32_0 : i32, i32
  }
}

</mosaic_0001>

<bundles_post_ra>
// kernel: tpu_custom_call.1
= control target key start
LH: loop header
LB: loop body
LE: loop exit
PB: predicated region body
PF: predicated region fallthrough
CT: control target
= control target key end

     0   :  { %18 = vsyncpa [#allocation3], 0  ;;  %s2009_s0 = inlined_call_operand.hbm [shape: bf16[56,384], index: 0, kind: input, shape index: {}]   ;;  %s2010_s1 = inlined_call_operand.hbm [shape: bf16[384,128], index: 1, kind: input, shape index: {}]   ;;  %s2011_s2 = inlined_call_operand.vmem [shape: f32[3,1,128], index: 2, kind: input, shape index: {}]   ;;  %s2012_s3 = inlined_call_operand.hbm [shape: bf16[16,16], index: 3, kind: input, shape index: {}]   ;;  %s2013_s4 = inlined_call_operand.hbm [shape: bf16[16,32], index: 4, kind: input, shape index: {}]   ;;  %s2014_s5 = inlined_call_operand.hbm [shape: bf16[256,128], index: 5, kind: input, shape index: {}]   ;;  %s2015_s6 = inlined_call_operand.vmem [shape: f32[3,1,128], index: 6, kind: input, shape index: {}]   ;;  %s2016_s7 = inlined_call_operand.vmem [shape: f32[3,1,128], index: 7, kind: input, shape index: {}]   ;;  %s2017_s8 = inlined_call_operand.vmem [shape: f32[2,16], index: 8, kind: input, shape index: {}]   ;;  %s2018_s9 = inlined_call_operand.hbm [shape: f32[16,128], index: 9, kind: output, shape index: {0}]   ;;  %s2019_s10 = inlined_call_operand.hbm [shape: f32[32,128], index: 10, kind: output, shape index: {1}]   ;;  %s2020_s11 = inlined_call_operand.hbm [shape: f32[8,128], index: 11, kind: output, shape index: {2}]   ;;  %s2021_s12 = inlined_call_operand.hbm [shape: f32[2,128], index: 12, kind: output, shape index: {3}]  }
   0x1   :  { %19 = vsyncpa [#allocation6], 0 }
   0x2   :  { %20 = vsyncpa [#allocation9], 0 }
   0x3   :  { %21 = vsyncpa [#allocation4], 0 }
   0x4   :  { %22 = vsyncpa [#allocation13], 0 }
   0x5   :  { %23 = vsyncpa [#allocation16], 0  ;;  %s1776_s21 = smov [#allocation5]  }
   0x6   :  { %s41_s22 = sshll.u32 %s1776_s21, 4  ;;  %s42_s22 = int_to_ptr.vmem [resolvable:$true] %s41_s22 }
   0x7   :  { %s1528_s23 = scalar_lea.vmem %s42_s22, 3072  ;;  %p1533_p1 = scmp.lt.s32.totalorder %s42_s22, %s42_s22 }
   0x8   :  { %p1529_p0 = scmp.ne.s32.totalorder %s42_s22, %s1528_s23  ;;  %p1534_p2 = scmp.lt.s32.totalorder %s1528_s23, %s1528_s23 }
   0xa   :  { %p1535_p3 = por %p1534_p2, %p1533_p1 }
   0xc   :  { %p1536_p4 = pnand %p1535_p3, %p1529_p0 }
   0xe   :  { %1539 = shalt.err (!%p1536_p4)
}
   0xf   :  { %s1777_s24 = smov 64   ;;  %s1778_s25 = smov 4  }
  0x10   :  { %47 = dma.hbm_to_vmem [thread:$0]  %s2010_s1, 3072, %s42_s22, [#allocation6], %s1777_s24, %s1777_s24, %s1778_s25  }
  0x11   :  { %s1779_s28 = smov [#allocation8]   ;;  %s1780_s30 = smov [#allocation2]  }
  0x12   :  { %s67_s29 = sshll.u32 %s1779_s28, 4  ;;  %s29_s13 = sshll.u32 %s1780_s30, 4  ;;  %s68_s29 = int_to_ptr.vmem [resolvable:$true] %s67_s29  ;;  %s30_s13 = int_to_ptr.vmem [resolvable:$true] %s29_s13 }
  0x13   :  { %s1548_s14 = scalar_lea.vmem %s68_s29, 128  ;;  %p1553_p6 = scmp.lt.s32.totalorder %s68_s29, %s68_s29 }
  0x14   :  { %p1549_p5 = scmp.ne.s32.totalorder %s68_s29, %s1548_s14  ;;  %p1554_p7 = scmp.lt.s32.totalorder %s1548_s14, %s1548_s14 }
  0x16   :  { %p1555_p8 = por %p1554_p7, %p1553_p6 }
  0x18   :  { %p1556_p9 = pnand %p1555_p8, %p1549_p5 }
  0x1a   :  { %1559 = shalt.err (!%p1556_p9)
}
  0x1b   :  { %73 = dma.hbm_to_vmem [thread:$0]  %s2013_s4, 128, %s68_s29, [#allocation9], %s1777_s24, %s1777_s24, %s1778_s25  }
  0x1c   :  { %s1568_s1 = scalar_lea.vmem %s30_s13, 1344  ;;  %p1573_p11 = scmp.lt.s32.totalorder %s30_s13, %s30_s13 }
  0x1d   :  { %p1569_p10 = scmp.ne.s32.totalorder %s30_s13, %s1568_s1  ;;  %p1574_p12 = scmp.lt.s32.totalorder %s1568_s1, %s1568_s1 }
  0x1f   :  { %p1575_p13 = por %p1574_p12, %p1573_p11 }
  0x21   :  { %p1576_p0 = pnand %p1575_p13, %p1569_p10 }
  0x23   :  { %1579 = shalt.err (!%p1576_p0)
}
  0x24   :  { %s1781_s17 = smov 192   ;;  %s1782_s18 = smov 12  }
  0x25   :  { %35 = dma.hbm_to_vmem [thread:$0]  %s2009_s0, 1344, %s30_s13, [#allocation3], %s1781_s17, %s1781_s17, %s1782_s18  }
  0x26   :  { %s1783_s21 = smov [#allocation7]   ;;  %s1784_s23 = smov [#allocation10]  }
  0x27   :  { %s55_s22 = sshll.u32 %s1783_s21, 4  ;;  %s79_s26 = sshll.u32 %s1784_s23, 4  ;;  %s56_s22 = int_to_ptr.vmem [resolvable:$true] %s55_s22  ;;  %s80_s26 = int_to_ptr.vmem [resolvable:$true] %s79_s26 }
  0x28   :  { %s1588_s4 = scalar_lea.vmem %s56_s22, 128  ;;  %p1593_p2 = scmp.lt.s32.totalorder %s56_s22, %s56_s22 }
  0x29   :  { %p1589_p1 = scmp.ne.s32.totalorder %s56_s22, %s1588_s4  ;;  %p1594_p3 = scmp.lt.s32.totalorder %s1588_s4, %s1588_s4 }
  0x2b   :  { %p1595_p4 = por %p1594_p3, %p1593_p2 }
  0x2d   :  { %p1596_p5 = pnand %p1595_p4, %p1589_p1 }
  0x2f   :  { %1599 = shalt.err (!%p1596_p5)
}
  0x30   :  { %61 = dma.hbm_to_vmem [thread:$0]  %s2012_s3, 128, %s56_s22, [#allocation6], %s1777_s24, %s1777_s24, %s1778_s25  }
  0x31   :  { %s1608_s0 = scalar_lea.vmem %s80_s26, 2048  ;;  %p1613_p7 = scmp.lt.s32.totalorder %s80_s26, %s80_s26 }
  0x32   :  { %p1609_p6 = scmp.ne.s32.totalorder %s80_s26, %s1608_s0  ;;  %p1614_p8 = scmp.lt.s32.totalorder %s1608_s0, %s1608_s0 }
  0x34   :  { %p1615_p9 = por %p1614_p8, %p1613_p7 }
  0x36   :  { %p1616_p10 = pnand %p1615_p9, %p1609_p6 }
  0x38   :  { %1619 = shalt.err (!%p1616_p10)
}
  0x39   :  { %85 = dma.hbm_to_vmem [thread:$0]  %s2014_s5, 2048, %s80_s26, [#allocation9], %s1777_s24, %s1777_s24, %s1778_s25  }
  0x3a   :  { %1732 = dma.done.wait [#allocation3], 1344  }
  0x3b   :  { %1733 = vsyncadd [#allocation3], 4294965952 }
  0x3c   :  { %1734 = dma.done.wait [#allocation6], 3200  }
  0x3d   :  { %1735 = vsyncadd [#allocation6], 4294964096 }
  0x3e   :  { %1736 = dma.done.wait [#allocation9], 2176  }
  0x3f   :  { %1737 = vsyncadd [#allocation9], 4294965120  ;;  %v1443_v0 = vld [vmem:[#allocation5 + $0x78] sm:$0xff]   ;;  %v1446_v3 = vld [vmem:[#allocation5 + $0x70] sm:$0xff]   ;;  %s1910_s15 = smov 0  }
  0x40   :  { %v1444_v1 = vld [vmem:[#allocation5 + $0x38] sm:$0xff]   ;;  %1233 = vmatprep.subr.bf16.mxu0 %v1443_v0  ;;  %v1447_v4 = vld [vmem:[#allocation5 + $0x30] sm:$0xff]   ;;  %v1449_v6 = vld [vmem:[#allocation5 + $0x68] sm:$0xff]  }
  0x41   :  { %v1445_v2 = vld [vmem:[#allocation5 + $0xb8] sm:$0xff]   ;;  %1234 = vmatpush3.bf16.msra.mxu0 %v1444_v1  ;;  %v1448_v5 = vld [vmem:[#allocation5 + $0xb0] sm:$0xff]   ;;  %v1450_v7 = vld [vmem:[#allocation5 + $0x28] sm:$0xff]  }
  0x42   :  { %1315 = vmatprep.subr.bf16.mxu1 %v1445_v2  ;;  %1235 = vmatprep.subr.bf16.mxu0 %v1446_v3  ;;  %v1451_v8 = vld [vmem:[#allocation5 + $0xa8] sm:$0xff]   ;;  %v1452_v9 = vld [vmem:[#allocation5 + $0x60] sm:$0xff]   ;;  %v1455_v12 = vld [vmem:[#allocation5 + $0x58] sm:$0xff]  }
  0x43   :  { %1316 = vmatpush3.bf16.msra.mxu1 %v1445_v2  ;;  %v1453_v10 = vld [vmem:[#allocation5 + $0x20] sm:$0xff]   ;;  %v1457_v13 = vld [vmem:[#allocation5 + $0x98] sm:$0xff]   ;;  %v1458_v15 = vld [vmem:[#allocation5 + $0x50] sm:$0xff]  }
  0x44   :  { %1317 = vmatprep.subr.bf16.mxu1 %v1448_v5  ;;  %v1454_v11 = vld [vmem:[#allocation5 + $0xa0] sm:$0xff]   ;;  %v1456_v14 = vld [vmem:[#allocation5 + $0x18] sm:$0xff]   ;;  %v1460_v16 = vld [vmem:[#allocation5 + $0x90] sm:$0xff]  }
  0x45   :  { %1236 = vmatpush3.bf16.msra.mxu0 %v1447_v4  ;;  %v1459_v17 = vld [vmem:[#allocation5 + $0x10] sm:$0xff]   ;;  %v1461_v18 = vld [vmem:[#allocation5 + $0x48] sm:$0xff]   ;;  %v1464_v21 = vld [vmem:[#allocation5 + $0x40] sm:$0xff]  }
  0x46   :  { %1237 = vmatprep.subr.bf16.mxu0 %v1449_v6  ;;  %v1462_v19 = vld [vmem:[#allocation5 + $0x8] sm:$0xff]   ;;  %v1466_v22 = vld [vmem:[#allocation5 + $0x80] sm:$0xff]   ;;  %v1469_v23 = vld [vmem:[#allocation2 + $0x4] ss:$12 sps:$4 sm:$0xff]  }
  0x47   :  { %1318 = vmatpush3.bf16.msra.mxu1 %v1448_v5  ;;  %v1463_v20 = vld [vmem:[#allocation5 + $0x88] sm:$0xff]   ;;  %v1470_v24 = vld [vmem:[#allocation2 + $0x8] ss:$12 sps:$4 sm:$0xff]   ;;  %405 = vmatprep.mubr.bf16.mxu0 %v1469_v23  ;;  %v1477_v29 = vld [vmem:[#allocation2 + $0x38] ss:$12 sps:$4 sm:$0xff]  }
  0x48   :  { %1319 = vmatprep.subr.bf16.mxu1 %v1451_v8  ;;  %v1465_v25 = vld [vmem:[#allocation5] sm:$0xff]   ;;  %1331 = vmatprep.mubr.bf16.mxu1 %v1470_v24  ;;  %v1467_v26 = vld [vmem:[#allocation2] ss:$12 sps:$4 sm:$0xff]   ;;  %v1472_v27 = vld [vmem:[#allocation2 + $0x1c] ss:$12 sps:$4 sm:$0xff]  }
  0x49   :  { %1238 = vmatpush3.bf16.msra.mxu0 %v1450_v7  ;;  %v1471_v28 = vld [vmem:[#allocation2 + $0x20] ss:$12 sps:$4 sm:$0xff]   ;;  %v1474_v30 = vld [vmem:[#allocation2 + $0x18] ss:$12 sps:$4 sm:$0xff]   ;;  %v1479_v32 = vld [vmem:[#allocation2 + $0x50] ss:$0 sps:$4 sm:$0xff]  }
  0x4a   :  { %1239 = vmatprep.subr.bf16.mxu0 %v1452_v9  ;;  %v1475_v31 = vld [vmem:[#allocation2 + $0x34] ss:$12 sps:$4 sm:$0xff]   ;;  %v120_v33 = vld [vmem:[#allocation2 + $0x48] sm:$0xff]  ;;  %v1478_v34 = vld [vmem:[#allocation2 + $0x30] ss:$12 sps:$4 sm:$0xff]  }
  0x4b   :  { %1320 = vmatpush3.bf16.msra.mxu1 %v1451_v8  ;;  %v1171_v35 = vcombine.high %v120_v33, %v120_v33  ;;  %v1170_v36 = vcombine.low %v120_v33, %v120_v33  ;;  %v1197_v43 = vld [vmem:[%s2011_s2] ss:$0 sm:$0xff]  ;;  %v1199_v56 = vld [vmem:[%s2011_s2 + $0x1] ss:$0 sm:$0xff] }
  0x4c   :  { %1321 = vmatprep.subr.bf16.mxu1 %v1454_v11 }
  0x4d   :  { %1240 = vmatpush3.bf16.msra.mxu0 %v1453_v10 }
  0x4e   :  { %1241 = vmatprep.subr.bf16.mxu0 %v1455_v12 }
  0x4f   :  { %1322 = vmatpush3.bf16.msra.mxu1 %v1454_v11 }
  0x50   :  { %1323 = vmatprep.subr.bf16.mxu1 %v1457_v13 }
  0x51   :  { %1242 = vmatpush3.bf16.msra.mxu0 %v1456_v14 }
  0x52   :  { %1243 = vmatprep.subr.bf16.mxu0 %v1458_v15 }
  0x53   :  { %1324 = vmatpush3.bf16.msra.mxu1 %v1457_v13 }
  0x54   :  { %1325 = vmatprep.subr.bf16.mxu1 %v1460_v16 }
  0x55   :  { %1244 = vmatpush3.bf16.msra.mxu0 %v1459_v17 }
  0x56   :  { %1245 = vmatprep.subr.bf16.mxu0 %v1461_v18 }
  0x57   :  { %1326 = vmatpush3.bf16.msra.mxu1 %v1460_v16  ;;  %v1201_v16 = vld [vmem:[%s2011_s2 + $0x2] ss:$0 sm:$0xff] }
  0x58   :  { %1327 = vmatprep.subr.bf16.mxu1 %v1463_v20 }
  0x59   :  { %1246 = vmatpush3.bf16.msra.mxu0 %v1462_v19 }
  0x5a   :  { %1247 = vmatprep.subr.bf16.mxu0 %v1464_v21 }
  0x5b   :  { %1328 = vmatpush3.bf16.msra.mxu1 %v1463_v20 }
  0x5c   :  { %1329 = vmatprep.subr.bf16.mxu1 %v1466_v22 }
  0x5d   :  { %1248 = vmatpush3.bf16.msra.mxu0 %v1465_v25 }
  0x5f   :  { %1330 = vmatpush3.bf16.msra.mxu1 %v1466_v22 }
  0x60   :  { %406 = vmatmul.mubr.bf16.vlgmr.msra.gmra.mxu0 %v1467_v26 }
  0x61   :  { %413 = vmatprep.mubr.bf16.mxu0 %v1472_v27 }
  0x62   :  { %1332 = vmatmul.mubr.bf16.vlgmr.msra.gmra.mxu1 %v1471_v28 }
  0x63   :  { %1335 = vmatprep.mubr.bf16.mxu1 %v1477_v29 }
  0x68   :  { %414 = vmatmul.mubr.bf16.gmra.mxu0 %v1474_v30 }
  0x69   :  { %421 = vmatprep.mubr.bf16.mxu0 %v1475_v31 }
  0x6a   :  { %1336 = vmatmul.mubr.bf16.gmra.mxu1 %v1479_v32 }
  0x70   :  { %422 = vmatmul.mubr.bf16.gmra.mxu0 %v1478_v34 }
  0x71   :  { %429 = vmatprep.mubr.bf16.mxu0 %v1171_v35 }
  0x78   :  { %430 = vmatmul.mubr.bf16.gmra.mxu0 %v1170_v36 }
 0x120   :  { %v1249_v37 = vpop.f32.mrf.mxu0 }
 0x122   :  { %v1250_v38 = vpop.f32.mrf.mxu0  ;;  %v1333_v39 = vpop.f32.mrf.mxu1 }
 0x123   :  { %v1251_v40 = vadd.f32 %v1250_v38, %v1249_v37 }
 0x124   :  { %v1252_v41 = vpop.f32.mrf.mxu0  ;;  %v471_v42 = vpop.f32.mrf.mxu1 }
 0x125   :  { %v472_v44 = vadd.f32 %v1251_v40, %v471_v42 }
 0x126   :  { %v1253_v45 = vpop.f32.mrf.mxu0  ;;  %v1334_v46 = vpop.f32.mrf.mxu1 }
 0x127   :  { %v508_v47 = vadd.f32 %v1197_v43, %v472_v44   ;;  %v1254_v48 = vadd.f32 %v1253_v45, %v1252_v41 }
 0x128   :  { %v1255_v49 = vpop.f32.mrf.mxu0  ;;  %v474_v50 = vpop.f32.mrf.mxu1 }
 0x129   :  { %v475_v51 = vadd.f32 %v1254_v48, %v474_v50 }
 0x12a   :  { %v1256_v52 = vpop.f32.mrf.mxu0  ;;  %v1337_v53 = vpop.f32.mrf.mxu1 }
 0x12b   :  { %v509_v54 = vadd.f32 %v1197_v43, %v475_v51   ;;  %v1257_v55 = vadd.f32 %v1256_v52, %v1255_v49 }
 0x12c   :  { %v1258_v57 = vpop.f32.mrf.mxu0  ;;  %v487_v58 = vpop.f32.mrf.mxu1 }
 0x12d   :  { %v480_v59 = vadd.f32 %v1333_v39, %v1257_v55 }
 0x12e   :  { %v1259_v60 = vpop.f32.mrf.mxu0  ;;  %v1338_v61 = vpop.f32.mrf.mxu1 }
 0x12f   :  { %v518_v62 = vadd.f32 %v1199_v56, %v480_v59   ;;  %v1260_v63 = vadd.f32 %v1259_v60, %v1258_v57 }
 0x130   :  { %v1261_v0 = vpop.f32.mrf.mxu0  ;;  %v490_v10 = vpop.f32.mrf.mxu1 }
 0x131   :  { %v483_v1 = vadd.f32 %v1334_v46, %v1260_v63 }
 0x132   :  { %v1262_v2 = vpop.f32.mrf.mxu0 }
 0x133   :  { %v519_v3 = vadd.f32 %v1199_v56, %v483_v1   ;;  %v1263_v4 = vadd.f32 %v1262_v2, %v1261_v0 }
 0x134   :  { %v1264_v5 = vpop.f32.mrf.mxu0 }
 0x135   :  { %v488_v6 = vadd.f32 %v1263_v4, %v487_v58 }
 0x136   :  { %v1265_v7 = vpop.f32.mrf.mxu0 }
 0x137   :  { %v520_v8 = vadd.f32 %v1199_v56, %v488_v6   ;;  %v1266_v9 = vadd.f32 %v1265_v7, %v1264_v5 }
 0x138   :  { %v1267_v11 = vpop.f32.mrf.mxu0 }
 0x139   :  { %v491_v12 = vadd.f32 %v1266_v9, %v490_v10 }
 0x13a   :  { %v1268_v13 = vpop.f32.mrf.mxu0 }
 0x13b   :  { %v521_v14 = vadd.f32 %v1199_v56, %v491_v12   ;;  %v1269_v15 = vadd.f32 %v1268_v13, %v1267_v11 }
 0x13c   :  { %v1270_v17 = vpop.f32.mrf.mxu0 }
 0x13d   :  { %v496_v18 = vadd.f32 %v1337_v53, %v1269_v15 }
 0x13e   :  { %v1271_v19 = vpop.f32.mrf.mxu0 }
 0x13f   :  { %v530_v20 = vadd.f32 %v1201_v16, %v496_v18  }
 0x140 LB: > { %v1785_v21 = vmov 0.0   ;;  %v1482_v22 = vld [vmem:[#allocation7] sm:$0xff]   ;;  %v546_v23 = vpack.c.bf16 %v1766_v54, %v1770_v47  ;;  %vm1786_vm0 = vmmov 0   ;;  %v1484_v24 = vld [vmem:[#allocation10 + $0x78] sm:$0xff]   ;;  %vm552_vm1 = vcmask 130048   ;;  %v1488_v31 = vld [vmem:[#allocation10 + $0x68] sm:$0xff]   ;;  %s1774_s15 = sphi %s1910_s15, %s536_s15   ;;  %v1770_v47 = vphi %v508_v47, %v2033_v47   ;;  %v1766_v54 = vphi %v509_v54, %v2032_v54   ;;  %v1762_v62 = vphi %v518_v62, %v2031_v62   ;;  %v1758_v3 = vphi %v519_v3, %v2030_v3   ;;  %v1754_v8 = vphi %v520_v8, %v2029_v8   ;;  %v1750_v14 = vphi %v521_v14, %v2028_v14   ;;  %v1746_v20 = vphi %v530_v20, %v2027_v20  }
 0x141   : > { %1339 = vmatprep.subr.bf16.mxu1 %v1785_v21  ;;  %1341 = vmatprep.mubr.msk.bf16.mxu1 %vm1786_vm0, %v1785_v21  ;;  %v601_v25 = vpack.c.bf16 %v1750_v14, %v1754_v8  ;;  %v1485_v26 = vld [vmem:[#allocation10 + $0x38] sm:$0xff]   ;;  %v877_v27 = vadd.f32 %v1758_v3, %v1762_v62  ;;  %v1486_v28 = vld [vmem:[#allocation10 + $0x70] sm:$0xff]   ;;  %v600_v32 = vpack.c.bf16 %v1758_v3, %v1762_v62  ;;  %vm607_vm2 = vcmask 261120   ;;  %v1489_v35 = vld [vmem:[#allocation10 + $0x28] sm:$0xff]   ;;  %s536_s15 = sadd.s32 1, %s1774_s15  }
 0x142   : > { %1340 = vmatpush3.bf16.msra.mxu1 %v546_v23  ;;  %1290 = vmatprep.subr.bf16.mxu0 %v1484_v24  ;;  %v1487_v29 = vld [vmem:[#allocation10 + $0x30] sm:$0xff]   ;;  %v1483_v34 = vld [vmem:[#allocation8] sm:$0xff]   ;;  %v1490_v37 = vld [vmem:[#allocation10 + $0x60] sm:$0xff]   ;;  %p533_p11 = scmp.ge.s32.totalorder %s536_s15, 3  }
 0x143   : > { %1345 = vmatprep.subr.bf16.mxu1 %v1785_v21  ;;  %1291 = vmatpush3.bf16.msra.mxu0 %v1485_v26  ;;  %v878_v30 = vadd.f32 %v1754_v8, %v877_v27  ;;  %v1491_v38 = vld [vmem:[#allocation10 + $0x20] sm:$0xff]   ;;  %v1492_v17 = vld [vmem:[#allocation10 + $0x58] sm:$0xff]   ;;  %v1494_v24 = vld [vmem:[#allocation10 + $0x50] sm:$0xff]   ;;  %vm1788_vm3 = vmmov (%p533_p11), 0   ;;  %s1790_s0 = smov (%p533_p11), [#allocation11]  }
 0x144   : > { %1292 = vmatprep.subr.bf16.mxu0 %v1486_v28  ;;  %v1493_v18 = vld [vmem:[#allocation10 + $0x18] sm:$0xff]   ;;  %v1496_v26 = vld [vmem:[#allocation10 + $0x48] sm:$0xff]   ;;  %v1498_v28 = vld [vmem:[#allocation10 + $0x40] sm:$0xff]   ;;  %s1078_s29 = sshll.u32 (%p533_p11), %s1790_s0, 4  ;;  %s1079_s29 = int_to_ptr.vmem [resolvable:$true] %s1078_s29 }
 0x145   : > { %1342 = vmatmul.mubr.msk.bf16.vlgmr.msra.gmra.mxu1 %vm552_vm1, %v1482_v22  ;;  %v879_v33 = vadd.f32 %v1750_v14, %v878_v30  ;;  %v1497_v27 = vld [vmem:[#allocation10 + $0x8] sm:$0xff]  }
 0x146   : > { %1346 = vmatpush3.bf16.msra.mxu1 %v601_v25  ;;  %1349 = vmatprep.mubr.msk.bf16.mxu1 %vm1786_vm0, %v1785_v21  ;;  %v1495_v25 = vld [vmem:[#allocation10 + $0x10] sm:$0xff]  }
 0x147   : > { %1347 = vmatprep.subr.bf16.mxu1 %v1785_v21  ;;  %1293 = vmatpush3.bf16.msra.mxu0 %v1487_v29  ;;  %v880_v36 = vrot.slane %v879_v33, 4  ;;  %v1499_v29 = vld [vmem:[#allocation10] sm:$0xff]  }
 0x148   : > { %1294 = vmatprep.subr.bf16.mxu0 %v1488_v31 }
 0x149   : > { %v881_v39 = vadd.f32 %v880_v36, %v879_v33 }
 0x14a   : > { %1348 = vmatpush3.bf16.msra.mxu1 %v600_v32 }
 0x14b   : > { %1295 = vmatpush3.bf16.msra.mxu0 %v1489_v35  ;;  %v882_v40 = vrot.slane %v881_v39, 2 }
 0x14c   : > { %1296 = vmatprep.subr.bf16.mxu0 %v1490_v37 }
 0x14d   : > { %1350 = vmatmul.mubr.msk.bf16.vlgmr.msra.gmra.mxu1 %vm607_vm2, %v1483_v34  ;;  %v883_v41 = vadd.f32 %v882_v40, %v881_v39 }
 0x14f   : > { %1297 = vmatpush3.bf16.msra.mxu0 %v1491_v38  ;;  %v884_v42 = vrot.slane %v883_v41, 1 }
 0x150   : > { %1298 = vmatprep.subr.bf16.mxu0 %v1492_v17 }
 0x151   : > { %v885_v43 = vadd.f32 %v884_v42, %v883_v41 }
 0x153   : > { %v887_v44 = vmul.f32 0.03125, %v885_v43  ;;  %1299 = vmatpush3.bf16.msra.mxu0 %v1493_v18 }
 0x154   : > { %1300 = vmatprep.subr.bf16.mxu0 %v1494_v24 }
 0x155   : > { %v888_v45 = vsub.f32 %v1762_v62, %v887_v44  ;;  %v889_v46 = vsub.f32 %v1758_v3, %v887_v44  ;;  %v890_v48 = vsub.f32 %v1754_v8, %v887_v44  ;;  %v891_v49 = vsub.f32 %v1750_v14, %v887_v44  ;;  %v1226_v3 = vld [vmem:[%s2015_s6 + $0x1] ss:$0 sm:$0xff] }
 0x156   : > { %v1227_v8 = vld [vmem:[%s2016_s7 + $0x1] ss:$0 sm:$0xff] }
 0x157   : > { %v892_v50 = vmul.f32 %v888_v45, %v888_v45  ;;  %v893_v51 = vmul.f32 %v889_v46, %v889_v46  ;;  %v894_v52 = vmul.f32 %v890_v48, %v890_v48  ;;  %v895_v53 = vmul.f32 %v891_v49, %v891_v49  ;;  %1301 = vmatpush3.bf16.msra.mxu0 %v1495_v25 }
 0x158   : > { %1302 = vmatprep.subr.bf16.mxu0 %v1496_v26 }
 0x159   : > { %v896_v55 = vadd.f32 %v893_v51, %v892_v50 }
 0x15b   : > { %v897_v56 = vadd.f32 %v896_v55, %v894_v52  ;;  %1303 = vmatpush3.bf16.msra.mxu0 %v1497_v27 }
 0x15c   : > { %1304 = vmatprep.subr.bf16.mxu0 %v1498_v28 }
 0x15d   : > { %v898_v57 = vadd.f32 %v897_v56, %v895_v53  ;;  %v952_v53 = vrot.slane %v1746_v20, 4 }
 0x15f   : > { %v899_v58 = vrot.slane %v898_v57, 4  ;;  %1305 = vmatpush3.bf16.msra.mxu0 %v1499_v29  ;;  %v953_v55 = vadd.f32 %v1746_v20, %v952_v53  ;;  %v1223_v53 = vld [vmem:[%s2016_s7] ss:$0 sm:$0xff] }
 0x161   : > { %v900_v59 = vadd.f32 %v899_v58, %v898_v57  ;;  %v954_v56 = vrot.slane %v953_v55, 2 }
 0x163   : > { %v901_v60 = vrot.slane %v900_v59, 2  ;;  %v955_v57 = vadd.f32 %v954_v56, %v953_v55 }
 0x165   : > { %v902_v61 = vadd.f32 %v901_v60, %v900_v59  ;;  %v956_v58 = vrot.slane %v955_v57, 1 }
 0x167   : > { %v903_v63 = vrot.slane %v902_v61, 1  ;;  %v957_v59 = vadd.f32 %v956_v58, %v955_v57 }
 0x169   : > { %v904_v0 = vadd.f32 %v903_v63, %v902_v61  ;;  %v959_v60 = vmul.f32 0.125, %v957_v59 }
 0x16b   : > { %v905_v1 = vmul.f32 0.03125, %v904_v0  ;;  %v960_v61 = vsub.f32 %v1746_v20, %v959_v60  ;;  %v1231_v20 = vld [vmem:[%s2016_s7 + $0x2] ss:$0 sm:$0xff] }
 0x16d   : > { %v906_v2 = vadd.f32 1e-05, %v905_v1  ;;  %v961_v63 = vmul.f32 %v960_v61, %v960_v61 }
 0x16f   : > { %1500 = vrsqrt.f32 %v906_v2  ;;  %v962_v0 = vrot.slane %v961_v63, 4 }
 0x171   : > { %v963_v1 = vadd.f32 %v962_v0, %v961_v63 }
 0x173   : > { %v964_v2 = vrot.slane %v963_v1, 2 }
 0x17c   : > { %v1501_v62 = vpop.eup %1500 }
 0x17d   : > { %v908_v4 = vmul.f32 %v1501_v62, %v888_v45  ;;  %v909_v5 = vmul.f32 %v1501_v62, %v889_v46  ;;  %v910_v6 = vmul.f32 %v1501_v62, %v890_v48  ;;  %v911_v7 = vmul.f32 %v1501_v62, %v891_v49 }
 0x17f   : > { %v918_v9 = vmul.f32 %v1226_v3, %v908_v4  ;;  %v919_v10 = vmul.f32 %v1226_v3, %v909_v5  ;;  %v920_v11 = vmul.f32 %v1226_v3, %v910_v6  ;;  %v921_v12 = vmul.f32 %v1226_v3, %v911_v7 }
 0x181   : > { %v928_v13 = vadd.f32 %v1227_v8, %v918_v9  ;;  %v929_v14 = vadd.f32 %v1227_v8, %v919_v10  ;;  %v930_v15 = vadd.f32 %v1227_v8, %v920_v11  ;;  %v931_v16 = vadd.f32 %v1227_v8, %v921_v12  ;;  %v1230_v9 = vld [vmem:[%s2015_s6 + $0x2] ss:$0 sm:$0xff] }
 0x183   : > { %v932_v19 = vmul.f32 0.5, %v928_v13  ;;  %v933_v21 = vmul.f32 0.5, %v929_v14  ;;  %v934_v22 = vmul.f32 0.5, %v930_v15  ;;  %v935_v23 = vmul.f32 0.5, %v931_v16 }
 0x185   : > { %1502 = vtanh.f32 %v932_v19 }
 0x186   : > { %1504 = vtanh.f32 %v933_v21 }
 0x187   : > { %1506 = vtanh.f32 %v934_v22 }
 0x188   : > { %1508 = vtanh.f32 %v935_v23 }
 0x192   : > { %v1503_v30 = vpop.eup %1502 }
 0x193   : > { %v1505_v31 = vpop.eup %1504  ;;  %v940_v32 = vmul.f32 0.5, %v1503_v30 }
 0x194   : > { %v1507_v33 = vpop.eup %1506  ;;  %v941_v34 = vmul.f32 0.5, %v1505_v31 }
 0x195   : > { %v1509_v35 = vpop.eup %1508  ;;  %v942_v36 = vmul.f32 0.5, %v1507_v33  ;;  %v1939_v62 = vadd.f32 0.5, %v940_v32  }
 0x196   : > { %v943_v38 = vmul.f32 0.5, %v1509_v35  ;;  %v1941_v3 = vadd.f32 0.5, %v941_v34  }
 0x197   : > { %v2022_v37 = vmov %v1939_v62  ;;  %v1943_v8 = vadd.f32 0.5, %v942_v36   ;;  %v965_v62 = vadd.f32 %v964_v2, %v963_v1 }
 0x198   : > { %v2023_v39 = vmov %v1941_v3  ;;  %v1945_v14 = vadd.f32 0.5, %v943_v38   ;;  %992 = vst [vmem:[#allocation12] sm:$0xff] (%p533_p11), %v2022_v37 }
 0x199   : > { %v2024_v40 = vmov %v1943_v8  ;;  %v966_v3 = vrot.slane %v965_v62, 1  ;;  %993 = vst [vmem:[#allocation12 + $0x8] sm:$0xff] (%p533_p11), %v2023_v39 }
 0x19a   : > { %v2025_v41 = vmov %v1945_v14  ;;  %994 = vst [vmem:[#allocation12 + $0x10] sm:$0xff] (%p533_p11), %v2024_v40 }
 0x19b   : > { %v967_v4 = vadd.f32 %v966_v3, %v965_v62  ;;  %v2030_v3 = vmov %v2023_v39  ;;  %v2031_v62 = vmov %v2022_v37  ;;  %995 = vst [vmem:[#allocation12 + $0x18] sm:$0xff] (%p533_p11), %v2025_v41 }
 0x19c   :  { %v997_v62 = vld [vmem:[%s2017_s8] sm:$0x3] (%p533_p11) }
 0x19d   : > { %v968_v5 = vmul.f32 0.125, %v967_v4 }
 0x19f   : > { %v969_v6 = vadd.f32 1e-05, %v968_v5  ;;  %v1787_v5 = vmov (%p533_p11), 0.0  }
 0x1a0   :  { %1353 = vmatprep.subr.mxu0 (%p533_p11), %v1787_v5 }
 0x1a1   : > { %1510 = vrsqrt.f32 %v969_v6 }
 0x1ae   : > { %v1511_v7 = vpop.eup %1510 }
 0x1af   : > { %v971_v8 = vmul.f32 %v1511_v7, %v960_v61 }
 0x1b1   : > { %v978_v10 = vmul.f32 %v1230_v9, %v971_v8  ;;  %v2029_v8 = vmov %v2024_v40 }
 0x1b3   : > { %v985_v11 = vadd.f32 %v1231_v20, %v978_v10 }
 0x1b5   : > { %v986_v12 = vmul.f32 0.5, %v985_v11 }
 0x1b7   : > { %1512 = vtanh.f32 %v986_v12 }
 0x1c4   : > { %v1513_v13 = vpop.eup %1512 }
 0x1c5   : > { %v988_v14 = vmul.f32 0.5, %v1513_v13 }
 0x1c7   : > { %v1956_v20 = vadd.f32 0.5, %v988_v14   ;;  %v2028_v14 = vmov %v2025_v41 }
 0x1c9   : > { %v2026_v15 = vmov %v1956_v20 }
 0x1ca   : > { %v2027_v20 = vmov %v2026_v15  ;;  %996 = vst [vmem:[#allocation14] sm:$0xff] (%p533_p11), %v2026_v15 }
 0x205   : > { %v590_v42 = vpop.f32.mrf.mxu1 }
 0x207   : > { %v1343_v43 = vpop.f32.mrf.mxu1 }
 0x209   : > { %v593_v44 = vpop.f32.mrf.mxu1 }
 0x20a   : > { %v597_v51 = vpack.c.bf16 %v593_v44, %v590_v42 }
 0x20b   : > { %v1344_v45 = vpop.f32.mrf.mxu1 }
 0x20d   : > { %v645_v46 = vpop.f32.mrf.mxu1 }
 0x20f   : > { %v1351_v48 = vpop.f32.mrf.mxu1 }
 0x211   : > { %v648_v49 = vpop.f32.mrf.mxu1 }
 0x212   : > { %v652_v50 = vpack.c.bf16 %v648_v49, %v645_v46 }
 0x213   : > { %v1352_v52 = vpop.f32.mrf.mxu1 }
 0x214   : > { %813 = vmatprep.mubr.bf16.mxu0 %v652_v50  ;;  %v1222_v50 = vld [vmem:[%s2015_s6] ss:$0 sm:$0xff]  ;;  %s1789_s6 = smov (%p533_p11), [#allocation12]  }
 0x215   : > { %814 = vmatmul.mubr.bf16.vlgmr.msra.gmra.mxu0 %v597_v51  ;;  %s1090_s7 = sshll.u32 (%p533_p11), %s1789_s6, 4  ;;  %s1091_s7 = int_to_ptr.vmem [resolvable:$true] %s1090_s7 }
 0x216   :  { %1357 = vmatprep.mubr.msk.f32.mxu0 (%p533_p11), %vm1788_vm3, %v1787_v5  ;;  %s1620_s30 = scalar_lea.vmem (%p533_p11), %s1091_s7, 512  ;;  %p1625_p13 = scmp.lt.s32.totalorder (%p533_p11), %s1091_s7, %s1091_s7 }
 0x217   :  { %p1621_p12 = scmp.ne.s32.totalorder (%p533_p11), %s1091_s7, %s1620_s30  ;;  %p1626_p0 = scmp.lt.s32.totalorder (%p533_p11), %s1620_s30, %s1620_s30 }
 0x219   :  { %p1627_p1 = por (%p533_p11), %p1626_p0, %p1625_p13 }
 0x21b   :  { %p1628_p2 = pnand (%p533_p11), %p1627_p1, %p1621_p12 }
 0x2d5   : > { %v1306_v16 = vpop.f32.mrf.mxu0 }
 0x2d7   : > { %v1307_v17 = vpop.f32.mrf.mxu0 }
 0x2d8   : > { %v1308_v19 = vadd.f32 %v1307_v17, %v1306_v16 }
 0x2d9   : > { %v1309_v18 = vpop.f32.mrf.mxu0 }
 0x2da   : > { %v816_v23 = vadd.f32 %v1770_v47, %v1308_v19 }
 0x2db   : > { %v1310_v21 = vpop.f32.mrf.mxu0 }
 0x2dc   : > { %v1311_v22 = vadd.f32 %v1310_v21, %v1309_v18 }
 0x2de   : > { %v819_v24 = vadd.f32 %v1766_v54, %v1311_v22 }
 0x2e0   : > { %v824_v25 = vadd.f32 %v819_v24, %v816_v23 }
 0x2e2   : > { %v825_v26 = vrot.slane %v824_v25, 4 }
 0x2e4   : > { %v826_v27 = vadd.f32 %v825_v26, %v824_v25 }
 0x2e6   : > { %v827_v28 = vrot.slane %v826_v27, 2 }
 0x2e8   : > { %v828_v29 = vadd.f32 %v827_v28, %v826_v27 }
 0x2ea   : > { %v829_v30 = vrot.slane %v828_v29, 1 }
 0x2ec   : > { %v830_v31 = vadd.f32 %v829_v30, %v828_v29 }
 0x2ee   : > { %v832_v32 = vmul.f32 0.0625, %v830_v31 }
 0x2f0   : > { %v833_v33 = vsub.f32 %v816_v23, %v832_v32  ;;  %v834_v34 = vsub.f32 %v819_v24, %v832_v32 }
 0x2f2   : > { %v835_v35 = vmul.f32 %v833_v33, %v833_v33  ;;  %v836_v36 = vmul.f32 %v834_v34, %v834_v34 }
 0x2f4   : > { %v837_v38 = vadd.f32 %v836_v36, %v835_v35 }
 0x2f6   : > { %v838_v42 = vrot.slane %v837_v38, 4 }
 0x2f8   : > { %v839_v43 = vadd.f32 %v838_v42, %v837_v38 }
 0x2fa   : > { %v840_v44 = vrot.slane %v839_v43, 2 }
 0x2fc   : > { %v841_v45 = vadd.f32 %v840_v44, %v839_v43 }
 0x2fe   : > { %v842_v47 = vrot.slane %v841_v45, 1 }
 0x300   : > { %v843_v46 = vadd.f32 %v842_v47, %v841_v45 }
 0x302   : > { %v844_v54 = vmul.f32 0.0625, %v843_v46 }
 0x304   : > { %v845_v48 = vadd.f32 1e-05, %v844_v54 }
 0x306   : > { %1514 = vrsqrt.f32 %v845_v48 }
 0x313   : > { %v1515_v49 = vpop.eup %1514 }
 0x314   : > { %v847_v51 = vmul.f32 %v1515_v49, %v833_v33  ;;  %v848_v52 = vmul.f32 %v1515_v49, %v834_v34 }
 0x316   : > { %v855_v55 = vmul.f32 %v1222_v50, %v847_v51  ;;  %v856_v56 = vmul.f32 %v1222_v50, %v848_v52 }
 0x318   : > { %v863_v57 = vadd.f32 %v1223_v53, %v855_v55  ;;  %v864_v58 = vadd.f32 %v1223_v53, %v856_v56 }
 0x31a   : > { %v865_v59 = vmul.f32 0.5, %v863_v57  ;;  %v866_v60 = vmul.f32 0.5, %v864_v58 }
 0x31c   : > { %1516 = vtanh.f32 %v865_v59 }
 0x31d   : > { %1518 = vtanh.f32 %v866_v60 }
 0x329   : > { %v1517_v61 = vpop.eup %1516 }
 0x32a   : > { %v1519_v63 = vpop.eup %1518  ;;  %v869_v0 = vmul.f32 0.5, %v1517_v61 }
 0x32b   : > { %v870_v1 = vmul.f32 0.5, %v1519_v63  ;;  %535 = sbr.rel (!%p533_p11) target bundleno = 320 (0x140), region = 113 }
 0x32c   : > { %v871_v2 = vadd.f32 0.5, %v869_v0  }
 0x32d   : > { %v872_v4 = vadd.f32 0.5, %v870_v1  }
 0x32e   : > { %v2033_v47 = vmov %v871_v2  ;;  %990 = vst [vmem:[#allocation11] sm:$0xff] (%p533_p11), %v871_v2 }
 0x32f   : > { %v2032_v54 = vmov %v872_v4  ;;  %991 = vst [vmem:[#allocation11 + $0x8] sm:$0xff] (%p533_p11), %v872_v4  ;;  %1354 = vmatpush3.msra.mxu0 (%p533_p11), %v872_v4 }
 0x330   :  { %1355 = vmatprep.subr.mxu0 %v1787_v5 }
 0x331   :  { %1356 = vmatpush3.msra.mxu0 %v871_v2 }
 0x332   :  { %1358 = vmatmul.mubr.msk.f32.vlgmr.msra.gmra.mxu0 %vm552_vm1, %v997_v62 }
 0x333   :  { %1631 = shalt.err (!%p1628_p2)
}
 0x334   :  { %s1791_s3 = smov 128   ;;  %s1792_s5 = smov 8  }
 0x335   :  { %1096 = dma.vmem_to_hbm [thread:$0]  %s1091_s7, 512, %s2019_s10, [#allocation13], %s1791_s3, %s1791_s3, %s1792_s5  }
 0x336   :  { %s1640_s25 = scalar_lea.vmem %s1079_s29, 256  ;;  %p1645_p4 = scmp.lt.s32.totalorder %s1079_s29, %s1079_s29 }
 0x337   :  { %p1641_p3 = scmp.ne.s32.totalorder %s1079_s29, %s1640_s25  ;;  %p1646_p5 = scmp.lt.s32.totalorder %s1640_s25, %s1640_s25 }
 0x339   :  { %p1647_p6 = por %p1646_p5, %p1645_p4 }
 0x33b   :  { %p1648_p7 = pnand %p1647_p6, %p1641_p3 }
 0x33d   :  { %1651 = shalt.err (!%p1648_p7)
}
 0x33e   :  { %1084 = dma.vmem_to_hbm [thread:$0]  %s1079_s29, 256, %s2018_s9, [#allocation4], %s1791_s3, %s1791_s3, %s1792_s5  }
 0x33f   :  { %s1793_s15 = smov [#allocation14]  }
 0x340   :  { %s1103_s2 = sshll.u32 %s1793_s15, 4  ;;  %s1104_s2 = int_to_ptr.vmem [resolvable:$true] %s1103_s2 }
 0x341   :  { %s1660_s16 = scalar_lea.vmem %s1104_s2, 128  ;;  %p1665_p9 = scmp.lt.s32.totalorder %s1104_s2, %s1104_s2 }
 0x342   :  { %p1661_p8 = scmp.ne.s32.totalorder %s1104_s2, %s1660_s16  ;;  %p1666_p10 = scmp.lt.s32.totalorder %s1660_s16, %s1660_s16 }
 0x344   :  { %p1667_p11 = por %p1666_p10, %p1665_p9 }
 0x346   :  { %p1668_p12 = pnand %p1667_p11, %p1661_p8 }
 0x348   :  { %1671 = shalt.err (!%p1668_p12)
}
 0x349   :  { %1106 = dma.vmem_to_hbm [thread:$0]  %s1104_s2, 128, %s2020_s11, [#allocation13]  }
 0x34a   :  { %s1794_s17 = smov [#allocation15]  }
 0x34b   :  { %s1113_s18 = sshll.u32 %s1794_s17, 4  ;;  %s1114_s18 = int_to_ptr.vmem [resolvable:$true] %s1113_s18 }
 0x34c   :  { %s1680_s9 = scalar_lea.vmem %s1114_s18, 32  ;;  %p1685_p0 = scmp.lt.s32.totalorder %s1114_s18, %s1114_s18 }
 0x34d   :  { %p1681_p13 = scmp.ne.s32.totalorder %s1114_s18, %s1680_s9  ;;  %p1686_p1 = scmp.lt.s32.totalorder %s1680_s9, %s1680_s9 }
 0x34f   :  { %p1687_p2 = por %p1686_p1, %p1685_p0 }
 0x351   :  { %p1688_p3 = pnand %p1687_p2, %p1681_p13 }
 0x3f2   :  { %v1068_v37 = vpop.f32.mrf.mxu0 }
 0x3f3   :  { %1072 = vst [vmem:[#allocation15] sm:$0x3] %v1068_v37 }
 0x3f4   :  { %v1359_v39 = vpop.f32.mrf.mxu0 }
 0x3f5   :  { %1691 = shalt.err (!%p1688_p3)
}
 0x3f6   :  { %1116 = dma.vmem_to_hbm [thread:$0]  %s1114_s18, 32, %s2021_s12, [#allocation16]  }
 0x3f7   :  { %1738 = dma.done.wait [#allocation4], 256  }
 0x3f8   :  { %1739 = vsyncadd [#allocation4], 4294967040 }
 0x3f9   :  { %1740 = dma.done.wait [#allocation13], 640  }
 0x3fa   :  { %1741 = vsyncadd [#allocation13], 4294966656 }
 0x3fb   :  { %1742 = dma.done.wait [#allocation16], 32  }
 0x3fc   :  { %1743 = vsyncadd [#allocation16], 4294967264 }
 0x3fd   :  { %1129 = vsyncpa [#allocation3], 1 }
 0x3fe   :  { %1130 = vsyncpa [#allocation6], 1 }
 0x3ff   :  { %1131 = vsyncpa [#allocation9], 1 }
 0x400   :  { %1132 = vsyncpa [#allocation4], 1 }
 0x401   :  { %1133 = vsyncpa [#allocation13], 1 }
 0x402   :  { %1134 = vsyncpa [#allocation16], 1 }

</bundles_post_ra>
